<compile_context>
chip_gen: v6e
topology: v6e:2x2x1
jax: 0.10.0
libtpu: 0.0.40
codegen_flags: <defaults>
</compile_context>

<pallas_src>
import jax
import jax.numpy as jnp
from jax import lax
from jax.experimental import pallas as pl
from jax.experimental.pallas import tpu as pltpu

IN_FEATURES = 10
OUT_FEATURES = 5
TILE_B = 2048          # base row tile for the batch-tiled path
GRID_FREE_MAX = 2048   # below/at this, run a single grid-free block


def _linear_kernel_t(x_ref, w_ref, b_ref, o_ref):
    """o = w @ x.T + b on one block (lane-dense output).

    x_ref: (tile_B, IN)  w_ref: (OUT, IN)  b_ref: (OUT, 1)  o_ref: (OUT, tile_B)
    """
    # Contract w's IN axis (1) against x's IN axis (1) -> (OUT, tile_B),
    # accumulated in f32 on the MXU. No data-movement transpose is needed;
    # the MXU consumes the operands in this orientation directly.
    acc = lax.dot_general(
        w_ref[...], x_ref[...],
        dimension_numbers=(((1,), (1,)), ((), ())),
        preferred_element_type=jnp.float32,
    )
    o_ref[...] = (acc + b_ref[...]).astype(o_ref.dtype)


def _pick_tile(B):
    """Pick a row tile: multiple of 128 (lane-dense output blocks), even grid."""
    n = pl.cdiv(B, TILE_B)
    if n % 2 == 1:
        n += 1  # v7x: even tile count so both TensorCores get whole tiles
    tile = pl.cdiv(B, n)
    return ((tile + 127) // 128) * 128


def simple_model_forward(x, weight, bias):
    """y = x @ weight.T + bias, matching torch.nn.Linear(10, 5).

    x:      (B, 10) float32
    weight: (5, 10) float32  (PyTorch layout: (out_features, in_features))
    bias:   (5,)    float32
    returns (B, 5) float32
    """
    B = x.shape[0]
    b2d = bias.reshape(OUT_FEATURES, 1)  # broadcasts along the lane (batch) axis

    if B <= GRID_FREE_MAX:
        # Grid-free path: one whole-array VMEM block per operand, no pipeline
        # scaffolding. Output is (OUT, B); transpose once in the wrapper.
        out_t = pl.pallas_call(
            _linear_kernel_t,
            out_shape=jax.ShapeDtypeStruct((OUT_FEATURES, B), x.dtype),
            in_specs=[
                pl.BlockSpec(memory_space=pltpu.MemorySpace.VMEM),
                pl.BlockSpec(memory_space=pltpu.MemorySpace.VMEM),
                pl.BlockSpec(memory_space=pltpu.MemorySpace.VMEM),
            ],
            out_specs=pl.BlockSpec(memory_space=pltpu.MemorySpace.VMEM),
        )(x, weight, b2d)
        return out_t.T

    # Batch-tiled path: pipeline over row tiles, batch axis "parallel" so v7x
    # can shard it across its two TensorCores. Weight/bias use constant
    # index_maps so they stay VMEM-resident across grid steps. The output is
    # laid out (OUT, B) with the batch dim on lanes -> dense, unmasked stores.
    tile = _pick_tile(B)
    grid = (pl.cdiv(B, tile),)
    out_t = pl.pallas_call(
        _linear_kernel_t,
        out_shape=jax.ShapeDtypeStruct((OUT_FEATURES, B), x.dtype),
        grid=grid,
        in_specs=[
            pl.BlockSpec((tile, IN_FEATURES), lambda i: (i, 0)),
            pl.BlockSpec((OUT_FEATURES, IN_FEATURES), lambda i: (0, 0)),
            pl.BlockSpec((OUT_FEATURES, 1), lambda i: (0, 0)),
        ],
        out_specs=pl.BlockSpec((OUT_FEATURES, tile), lambda i: (0, i)),
        compiler_params=pltpu.CompilerParams(
            dimension_semantics=("parallel",),
        ),
    )(x, weight, b2d)
    return out_t.T


def _reference(x, weight, bias):
    return x @ weight.T + bias


if __name__ == "__main__":
    key = jax.random.PRNGKey(0)
    kx, kw, kb, kx2 = jax.random.split(key, 4)

    # Deterministic parameter init (mimics nn.Linear's U(-1/sqrt(in), 1/sqrt(in)))
    bound = 1.0 / (IN_FEATURES ** 0.5)
    weight = jax.random.uniform(
        kw, (OUT_FEATURES, IN_FEATURES), jnp.float32, -bound, bound)
    bias = jax.random.uniform(kb, (OUT_FEATURES,), jnp.float32, -bound, bound)

    # Small batch -> grid-free path.
    B_small = 8
    x_small = jax.random.normal(kx, (B_small, IN_FEATURES), jnp.float32)
    y_small = jax.block_until_ready(simple_model_forward(x_small, weight, bias))
    assert y_small.shape == (B_small, OUT_FEATURES)
    assert jnp.allclose(y_small, _reference(x_small, weight, bias),
                        atol=1e-5, rtol=1e-5), "small-batch mismatch vs reference"

    # Larger batch with a ragged tail -> batch-tiled lane-dense "parallel" path.
    B_big = 2 * TILE_B + 96   # not a multiple of the tile: exercises tail masking
    x_big = jax.random.normal(kx2, (B_big, IN_FEATURES), jnp.float32)
    y_big = jax.block_until_ready(simple_model_forward(x_big, weight, bias))
    assert y_big.shape == (B_big, OUT_FEATURES)
    assert jnp.allclose(y_big, _reference(x_big, weight, bias),
                        atol=1e-5, rtol=1e-5), "tiled-batch mismatch vs reference"

    print("KERNEL_OK")
</pallas_src>

<mosaic_0001>
module attributes {stable_mosaic.version = 11 : i64} {
  func.func @_linear_kernel_t(%arg0: memref<8x10xf32, #tpu.memory_space<vmem>>, %arg1: memref<5x10xf32, #tpu.memory_space<vmem>>, %arg2: memref<5x1xf32, #tpu.memory_space<vmem>>, %arg3: memref<5x8xf32, #tpu.memory_space<vmem>>) attributes {dimension_semantics = [], scalar_prefetch = 0 : i64, scratch_operands = 0 : i64, tpu.core_type = #tpu.core_type<tc>} {
    %c0 = arith.constant 0 : index
    %c0_0 = arith.constant 0 : index
    %0 = vector.load %arg1[%c0, %c0_0] : memref<5x10xf32, #tpu.memory_space<vmem>>, vector<5x10xf32>
    %c0_1 = arith.constant 0 : index
    %c0_2 = arith.constant 0 : index
    %1 = vector.load %arg0[%c0_1, %c0_2] : memref<8x10xf32, #tpu.memory_space<vmem>>, vector<8x10xf32>
    %cst = arith.constant dense<0.000000e+00> : vector<5x8xf32>
    %2 = tpu.matmul %0, %1, %cst {dimension_numbers = #tpu.dot_dimension_numbers<[1], [1], [0], [0], [0, 0, 1, 0], [], []>} : vector<5x10xf32>, vector<8x10xf32>, vector<5x8xf32> -> vector<5x8xf32>
    %c0_3 = arith.constant 0 : index
    %c0_4 = arith.constant 0 : index
    %3 = vector.load %arg2[%c0_3, %c0_4] : memref<5x1xf32, #tpu.memory_space<vmem>>, vector<5x1xf32>
    %4 = vector.broadcast %3 : vector<5x1xf32> to vector<5x8xf32>
    %5 = arith.addf %2, %4 : vector<5x8xf32>
    %c0_5 = arith.constant 0 : index
    %c0_6 = arith.constant 0 : index
    %6 = vector.load %arg3[%c0_5, %c0_6] : memref<5x8xf32, #tpu.memory_space<vmem>>, vector<5x8xf32>
    tpu.vector_store %arg3[%c0_5, %c0_6], %5 {strides = array<i32>} : memref<5x8xf32, #tpu.memory_space<vmem>>, vector<5x8xf32>,
    return
  }
}

</mosaic_0001>

<bundles_post_ra>
// kernel: tpu_custom_call.1
= control target key start
LH: loop header
LB: loop body
LE: loop exit
PB: predicated region body
PF: predicated region fallthrough
CT: control target
= control target key end

     0   :  { %8 = vsyncpa [#allocation3], 0  ;;  %s225_s0 = inlined_call_operand.vmem [shape: f32[8,10], index: 0, kind: input, shape index: {}]   ;;  %s226_s1 = inlined_call_operand.hbm [shape: f32[5,10], index: 1, kind: input, shape index: {}]   ;;  %s227_s2 = inlined_call_operand.vmem [shape: f32[5,1], index: 2, kind: input, shape index: {}]   ;;  %s228_s3 = inlined_call_operand.hbm [shape: f32[5,8], index: 3, kind: output, shape index: {}]  }
   0x1   :  { %9 = vsyncpa [#allocation4], 0  ;;  %s188_s12 = smov [#allocation2]  }
   0x2   :  { %s18_s13 = sshll.u32 %s188_s12, 4  ;;  %s19_s13 = int_to_ptr.vmem [resolvable:$true] %s18_s13 }
   0x3   :  { %s152_s14 = scalar_lea.vmem %s19_s13, 128  ;;  %p157_p1 = scmp.lt.s32.totalorder %s19_s13, %s19_s13 }
   0x4   :  { %p153_p0 = scmp.ne.s32.totalorder %s19_s13, %s152_s14  ;;  %p158_p2 = scmp.lt.s32.totalorder %s152_s14, %s152_s14 }
   0x6   :  { %p159_p3 = por %p158_p2, %p157_p1 }
   0x8   :  { %p160_p4 = pnand %p159_p3, %p153_p0 }
   0xa   :  { %163 = shalt.err (!%p160_p4)
}
   0xb   :  { %21 = dma.hbm_to_vmem [thread:$0]  %s226_s1, 128, %s19_s13, [#allocation3]  }
   0xc   :  { %184 = dma.done.wait [#allocation3], 128  }
   0xd   :  { %185 = vsyncadd [#allocation3], 4294967168  ;;  %v189_v0 = vmov 0.0   ;;  %vm190_vm0 = vmmov 0   ;;  %v191_v1 = vmov 0   ;;  %vm35_vm1 = vcmask 80896  }
   0xe   :  { %133 = vmatprep.subr.mxu0 %v189_v0  ;;  %135 = vmatprep.mubr.msk.f32.mxu0 %vm190_vm0, %v189_v0  ;;  %v28_v2 = vld [vmem:[%s225_s0] sm:$0xff]  ;;  %s192_s1 = smov [#allocation5]   ;;  %vm112_vm2 = vcmask 61440  }
   0xf   :  { %143 = vset.pattern.permute.xlu0 %v191_v1  ;;  %v29_v3 = vld [vmem:[%s227_s2] sm:$0x1f]  ;;  %134 = vmatpush3.xpose.msk.msra.mxu0 %vm35_vm1, %v28_v2  ;;  %s120_s21 = sshll.u32 %s192_s1, 4  ;;  %s121_s21 = int_to_ptr.vmem [resolvable:$true] %s120_s21 }
  0x10   :  { %v27_v4 = vld [vmem:[#allocation2] sm:$0x1f]  ;;  %32 = vperm.xlu0 %143, %v29_v3   ;;  %s164_s22 = scalar_lea.vmem %s121_s21, 128  ;;  %p169_p6 = scmp.lt.s32.totalorder %s121_s21, %s121_s21 }
  0x11   :  { %p165_p5 = scmp.ne.s32.totalorder %s121_s21, %s164_s22  ;;  %p170_p7 = scmp.lt.s32.totalorder %s164_s22, %s164_s22 }
  0x12   :  { %136 = vmatmul.mubr.msk.f32.vlgmr.msra.gmra.mxu0 %vm35_vm1, %v27_v4 }
  0x13   :  { %p171_p8 = por %p170_p7, %p169_p6 }
  0x15   :  { %p172_p9 = pnand %p171_p8, %p165_p5 }
  0x8b   :  { %v33_v5 = vpop.permute.xlu0 %32 }
  0xd2   :  { %v108_v6 = vpop.f32.mrf.mxu0 }
  0xd3   :  { %v109_v7 = vadd.f32 %v108_v6, %v33_v5 }
  0xd4   :  { %v137_v8 = vpop.f32.mrf.mxu0 }
  0xd5   :  { %113 = vst.msk [vmem:[#allocation5] sm:$0x1f] %vm112_vm2, %v109_v7 }
  0xd6   :  { %175 = shalt.err (!%p172_p9)
}
  0xd7   :  { %123 = dma.vmem_to_hbm [thread:$0]  %s121_s21, 128, %s228_s3, [#allocation4]  }
  0xd8   :  { %186 = dma.done.wait [#allocation4], 128  }
  0xd9   :  { %187 = vsyncadd [#allocation4], 4294967168 }
  0xda   :  { %127 = vsyncpa [#allocation3], 1 }
  0xdb   :  { %128 = vsyncpa [#allocation4], 1 }

</bundles_post_ra>
